<compile_context>
chip_gen: v7x
topology: tpu7x:2x2x1
jax: 0.10.0
libtpu: 0.0.40
codegen_flags: <defaults>
</compile_context>

<pallas_src>
import jax
import jax.numpy as jnp
from jax import lax
from jax.experimental import pallas as pl
from jax.experimental.pallas import tpu as pltpu


def _pick_col_tile(D):
    """Largest MXU-friendly column tile of Wsap that divides D."""
    for t in (1024, 512, 256, 128):
        if D % t == 0:
            return t
    return D


def pool_kernel(x_ref, gamma_ref, beta_ref, wsap_ref, bsap_ref, attn_ref,
                mu_ref, sg_ref, xn_scr, s_scr):
    """Grid = (batch, Wsap-column-tile).

    n == 0     : LayerNorm -> xn scratch (bf16), zero the score accumulator
    every n    : s(1,T) += tanh(xn @ Wsap[:, tile] + b[tile]) @ attn[tile]
                 (bf16 operands, f32 accumulation on the MXU)
    n == last  : softmax over T on the lane axis, mu = w @ xn,
                 E[x^2] = w @ (xn*xn), sg = sqrt(clamp(E[x^2] - mu^2, 1e-5))
    """
    n = pl.program_id(1)
    nk = pl.num_programs(1)

    @pl.when(n == 0)
    def _():
        # ---- nn.LayerNorm(D), eps=1e-5 (PyTorch default); math in f32 ----
        x = x_ref[0].astype(jnp.float32)                         # (T, D)
        mean = jnp.mean(x, axis=-1, keepdims=True)
        var = jnp.mean(jnp.square(x - mean), axis=-1, keepdims=True)
        xn = (x - mean) * lax.rsqrt(var + 1e-5)
        xn = xn * gamma_ref[...] + beta_ref[...]
        xn_scr[...] = xn.astype(xn_scr.dtype)                    # bf16 scratch
        s_scr[...] = jnp.zeros_like(s_scr)

    # ---- sap_linear column tile on the MXU ----
    h = jnp.tanh(jnp.dot(xn_scr[...], wsap_ref[...],
                         preferred_element_type=jnp.float32)
                 + bsap_ref[...])                                # (T, TN) f32

    # Lane-dense score accumulation: (1, TN) . (T, TN) contracted on TN -> (1, T)
    s_scr[...] += lax.dot_general(
        attn_ref[...], h.astype(jnp.bfloat16),
        dimension_numbers=(((1,), (1,)), ((), ())),
        preferred_element_type=jnp.float32)

    @pl.when(n == nk - 1)
    def _():
        # ---- softmax over T (scores live on the 128-lane axis) ----
        s = s_scr[...]                                           # (1, T)
        s = s - jnp.max(s, axis=-1, keepdims=True)
        e = jnp.exp(s)
        w = e * pl.reciprocal(jnp.sum(e, axis=-1, keepdims=True), approx=True)
        w_bf = w.astype(jnp.bfloat16)

        # ---- weighted statistics as MXU matmuls (no axis-0 sublane reduce) ----
        xn_bf = xn_scr[...]                                      # (T, D) bf16
        xn_f = xn_bf.astype(jnp.float32)
        xn2_bf = (xn_f * xn_f).astype(jnp.bfloat16)              # square in f32 (v5e)
        mu = jnp.dot(w_bf, xn_bf, preferred_element_type=jnp.float32)    # (1, D)
        ex2 = jnp.dot(w_bf, xn2_bf, preferred_element_type=jnp.float32)  # (1, D)
        sg = jnp.sqrt(jnp.maximum(ex2 - mu * mu, 1e-5))
        mu_ref[0, :, :] = mu
        sg_ref[0, :, :] = sg


def head_kernel(mu_ref, sg_ref, wmu_ref, wsg_ref, bfc_ref, wout_ref, bout_ref,
                o_ref):
    """Batched classifier head: ReLU(concat(mu, sg) @ Wfc + b) @ Wout + bout,
    emitted as one lane-dense (B, 128-padded) slab."""
    mu = mu_ref[...].astype(jnp.bfloat16)                        # (B, D)
    sg = sg_ref[...].astype(jnp.bfloat16)                        # (B, D)
    z = (jnp.dot(mu, wmu_ref[...], preferred_element_type=jnp.float32)
         + jnp.dot(sg, wsg_ref[...], preferred_element_type=jnp.float32)
         + bfc_ref[...])
    z = jnp.maximum(z, 0.0)                                      # ReLU; Dropout = identity (eval)
    out = (jnp.dot(z.astype(jnp.bfloat16), wout_ref[...],
                   preferred_element_type=jnp.float32) + bout_ref[...])
    o_ref[...] = out.astype(o_ref.dtype)


def emotion_classifier_forward(feats, gamma, beta, w_sap, b_sap, attn,
                               w_fc, b_fc, w_out, b_out):
    B, T, D = feats.shape
    H = w_fc.shape[1]
    O = w_out.shape[1]
    TN = _pick_col_tile(D)
    NK = D // TN

    # ---- dtype / layout plumbing (XLA side) ----
    feats_bf = feats.astype(jnp.bfloat16)            # halve input DMA + x-tile VMEM
    w_sap_bf = w_sap.astype(jnp.bfloat16)            # bf16 MXU weight streaming
    gamma2 = gamma.reshape(1, D).astype(jnp.float32)
    beta2 = beta.reshape(1, D).astype(jnp.float32)
    bsap2 = b_sap.reshape(1, D).astype(jnp.float32)
    attn_row = attn.reshape(1, D).astype(jnp.bfloat16)

    # VMEM budget for the chosen tiles (double-buffered x block + Wsap column
    # tile + LN scratch + small vectors), 2x headroom, capped for v7x (64 MiB).
    est = (2 * T * D * 2) + (2 * D * TN * 2) + (T * D * 2) + (8 * D * 4) + (4 * T * 4)
    vmem_limit = int(min(max(2 * est, 8 * 2 ** 20), 48 * 2 ** 20))

    mu, sg = pl.pallas_call(
        pool_kernel,
        out_shape=(jax.ShapeDtypeStruct((B, 1, D), jnp.float32),
                   jax.ShapeDtypeStruct((B, 1, D), jnp.float32)),
        grid=(B, NK),
        in_specs=[
            pl.BlockSpec((1, T, D), lambda b, n: (b, 0, 0)),   # hidden states (bf16)
            pl.BlockSpec((1, D), lambda b, n: (0, 0)),         # ln gamma
            pl.BlockSpec((1, D), lambda b, n: (0, 0)),         # ln beta
            pl.BlockSpec((D, TN), lambda b, n: (0, n)),        # sap_linear W column tile
            pl.BlockSpec((1, TN), lambda b, n: (0, n)),        # sap_linear bias tile
            pl.BlockSpec((1, TN), lambda b, n: (0, n)),        # attention vector tile
        ],
        out_specs=(pl.BlockSpec((1, 1, D), lambda b, n: (b, 0, 0)),   # mu
                   pl.BlockSpec((1, 1, D), lambda b, n: (b, 0, 0))),  # sg
        scratch_shapes=[pltpu.VMEM((T, D), jnp.bfloat16),      # LayerNormed features
                        pltpu.VMEM((1, T), jnp.float32)],      # lane-dense scores
        compiler_params=pltpu.CompilerParams(
            dimension_semantics=("parallel", "arbitrary"),
            vmem_limit_bytes=vmem_limit),
    )(feats_bf, gamma2, beta2, w_sap_bf, bsap2, attn_row)

    mu = mu.reshape(B, D)
    sg = sg.reshape(B, D)

    # ---- batched classifier head with lane-dense padded logits ----
    OP = ((O + 127) // 128) * 128
    w_fc_mu = w_fc[:D].astype(jnp.bfloat16)          # split the (2D, H) fc weight
    w_fc_sg = w_fc[D:].astype(jnp.bfloat16)
    b_fc2 = b_fc.reshape(1, H).astype(jnp.float32)
    w_out_p = jnp.zeros((H, OP), jnp.bfloat16).at[:, :O].set(w_out.astype(jnp.bfloat16))
    b_out_p = jnp.zeros((1, OP), jnp.float32).at[:, :O].set(b_out.astype(jnp.float32))

    logits_p = pl.pallas_call(
        head_kernel,
        out_shape=jax.ShapeDtypeStruct((B, OP), jnp.float32),
        grid=(1,),
        in_specs=[
            pl.BlockSpec((B, D), lambda i: (0, 0)),
            pl.BlockSpec((B, D), lambda i: (0, 0)),
            pl.BlockSpec((D, H), lambda i: (0, 0)),
            pl.BlockSpec((D, H), lambda i: (0, 0)),
            pl.BlockSpec((1, H), lambda i: (0, 0)),
            pl.BlockSpec((H, OP), lambda i: (0, 0)),
            pl.BlockSpec((1, OP), lambda i: (0, 0)),
        ],
        out_specs=pl.BlockSpec((B, OP), lambda i: (0, 0)),
        compiler_params=pltpu.CompilerParams(
            dimension_semantics=("arbitrary",)),
    )(mu, sg, w_fc_mu, w_fc_sg, b_fc2, w_out_p, b_out_p)

    return logits_p[:, :O]


def reference_forward(feats, gamma, beta, w_sap, b_sap, attn,
                      w_fc, b_fc, w_out, b_out):
    """Pure-JAX f32 reference mirroring the PyTorch forward (eval mode)."""
    mean = jnp.mean(feats, -1, keepdims=True)
    var = jnp.mean((feats - mean) ** 2, -1, keepdims=True)
    xn = (feats - mean) / jnp.sqrt(var + 1e-5) * gamma + beta
    h = jnp.tanh(xn @ w_sap + b_sap)
    s = jnp.squeeze(h @ attn.reshape(-1, 1), -1)             # (B, T)
    w = jax.nn.softmax(s, axis=1)[..., None]                 # (B, T, 1)
    mu = jnp.sum(xn * w, axis=1)
    sg = jnp.sqrt(jnp.clip(jnp.sum(xn * xn * w, axis=1) - mu * mu, 1e-5))
    feat = jnp.concatenate([mu, sg], axis=1)
    z = jax.nn.relu(feat @ w_fc + b_fc)
    return z @ w_out + b_out


if __name__ == "__main__":
    # Small shapes consistent with the forward: (B, T, D) hidden states from the
    # backbone, hidden_dim H, output_dim O.  (Real module uses D=4096.)
    B, T, D, H, O = 2, 16, 128, 32, 4

    key = jax.random.PRNGKey(0)
    ks = jax.random.split(key, 8)
    feats = jax.random.normal(ks[0], (B, T, D), jnp.float32)   # salmonn hidden_states[-1]

    # Deterministic synthetic parameters (shapes per module __init__).
    gamma = jnp.ones((D,), jnp.float32)                        # nn.LayerNorm
    beta = jnp.zeros((D,), jnp.float32)
    w_sap = 0.05 * jax.random.normal(ks[1], (D, D), jnp.float32)     # sap_linear (in, out)
    b_sap = 0.05 * jax.random.normal(ks[2], (D,), jnp.float32)
    # attention param (PyTorch init is std=1; scaled down here so the demo softmax
    # is well conditioned for the bf16-kernel vs f32-reference numeric check)
    attn = 0.1 * jax.random.normal(ks[3], (D,), jnp.float32)
    w_fc = 0.05 * jax.random.normal(ks[4], (2 * D, H), jnp.float32)  # fc: Linear(2D, H)
    b_fc = 0.05 * jax.random.normal(ks[5], (H,), jnp.float32)
    w_out = 0.05 * jax.random.normal(ks[6], (H, O), jnp.float32)     # out: Linear(H, O)
    b_out = 0.05 * jax.random.normal(ks[7], (O,), jnp.float32)

    out = emotion_classifier_forward(feats, gamma, beta, w_sap, b_sap, attn,
                                     w_fc, b_fc, w_out, b_out)
    out = jax.block_until_ready(out)

    ref = reference_forward(feats, gamma, beta, w_sap, b_sap, attn,
                            w_fc, b_fc, w_out, b_out)
    assert out.shape == (B, O)
    # bf16 MXU operands vs f32 reference -> relaxed tolerance.
    assert jnp.allclose(out, ref, atol=2e-2, rtol=2e-2), (
        f"kernel/reference mismatch, max abs diff {jnp.max(jnp.abs(out - ref))}")
    print("KERNEL_OK")
</pallas_src>

<mosaic_0001>
module attributes {stable_mosaic.version = 11 : i64} {
  func.func @pool_kernel(%arg0: i32, %arg1: i32, %arg2: memref<1x16x128xbf16, #tpu.memory_space<vmem>>, %arg3: memref<1x128xf32, #tpu.memory_space<vmem>>, %arg4: memref<1x128xf32, #tpu.memory_space<vmem>>, %arg5: memref<128x128xbf16, #tpu.memory_space<vmem>>, %arg6: memref<1x128xf32, #tpu.memory_space<vmem>>, %arg7: memref<1x128xbf16, #tpu.memory_space<vmem>>, %arg8: memref<1x1x128xf32, #tpu.memory_space<vmem>>, %arg9: memref<1x1x128xf32, #tpu.memory_space<vmem>>, %arg10: memref<16x128xbf16, #tpu.memory_space<vmem>>, %arg11: memref<1x16xf32, #tpu.memory_space<vmem>>) attributes {dimension_semantics = [#tpu.dimension_semantics<parallel>, #tpu.dimension_semantics<arbitrary>], iteration_bounds = array<i64: 2, 1>, scalar_prefetch = 0 : i64, scratch_operands = 2 : i64, tpu.core_type = #tpu.core_type<tc>, window_params = [{transform_indices = @transform_0, window_bounds = array<i64: 1, 16, 128>}, {pipeline_mode = #tpu.pipeline_mode<synchronous>, transform_indices = @transform_1, window_bounds = array<i64: 1, 128>}, {pipeline_mode = #tpu.pipeline_mode<synchronous>, transform_indices = @transform_2, window_bounds = array<i64: 1, 128>}, {transform_indices = @transform_3, window_bounds = array<i64: 128, 128>}, {transform_indices = @transform_4, window_bounds = array<i64: 1, 128>}, {transform_indices = @transform_5, window_bounds = array<i64: 1, 128>}, {transform_indices = @transform_6, window_bounds = array<i64: 1, 1, 128>}, {transform_indices = @transform_7, window_bounds = array<i64: 1, 1, 128>}]} {
    %c0_i32 = arith.constant 0 : i32
    %0 = arith.cmpi eq, %arg1, %c0_i32 : i32
    %1 = arith.extui %0 : i1 to i32
    %c0_i32_0 = arith.constant 0 : i32
    %2 = arith.cmpi ne, %1, %c0_i32_0 : i32
    scf.if %2 {
      %c0_15 = arith.constant 0 : index
      %c0_16 = arith.constant 0 : index
      %c0_17 = arith.constant 0 : index
      %19 = vector.load %arg2[%c0_15, %c0_16, %c0_17] : memref<1x16x128xbf16, #tpu.memory_space<vmem>>, vector<1x16x128xbf16>
      %20 = vector.shape_cast %19 : vector<1x16x128xbf16> to vector<16x128xbf16>
      %21 = arith.extf %20 : vector<16x128xbf16> to vector<16x128xf32>
      %cst_18 = arith.constant dense<0.000000e+00> : vector<16xf32>
      %22 = vector.multi_reduction <add>, %21, %cst_18 [1] : vector<16x128xf32> to vector<16xf32>
      %23 = vector.shape_cast %22 : vector<16xf32> to vector<16x1xf32>
      %cst_19 = arith.constant 1.280000e+02 : f32
      %24 = vector.broadcast %cst_19 : f32 to vector<16x1xf32>
      %25 = arith.divf %23, %24 : vector<16x1xf32>
      %26 = vector.broadcast %25 : vector<16x1xf32> to vector<16x128xf32>
      %27 = arith.subf %21, %26 : vector<16x128xf32>
      %28 = arith.mulf %27, %27 : vector<16x128xf32>
      %cst_20 = arith.constant dense<0.000000e+00> : vector<16xf32>
      %29 = vector.multi_reduction <add>, %28, %cst_20 [1] : vector<16x128xf32> to vector<16xf32>
      %30 = vector.shape_cast %29 : vector<16xf32> to vector<16x1xf32>
      %cst_21 = arith.constant 1.280000e+02 : f32
      %31 = vector.broadcast %cst_21 : f32 to vector<16x1xf32>
      %32 = arith.divf %30, %31 : vector<16x1xf32>
      %33 = vector.broadcast %25 : vector<16x1xf32> to vector<16x128xf32>
      %34 = arith.subf %21, %33 : vector<16x128xf32>
      %cst_22 = arith.constant 9.99999974E-6 : f32
      %35 = vector.broadcast %cst_22 : f32 to vector<16x1xf32>
      %36 = arith.addf %32, %35 : vector<16x1xf32>
      %37 = math.rsqrt %36 : vector<16x1xf32>
      %38 = vector.broadcast %37 : vector<16x1xf32> to vector<16x128xf32>
      %39 = arith.mulf %34, %38 : vector<16x128xf32>
      %c0_23 = arith.constant 0 : index
      %c0_24 = arith.constant 0 : index
      %40 = vector.load %arg3[%c0_23, %c0_24] : memref<1x128xf32, #tpu.memory_space<vmem>>, vector<1x128xf32>
      %41 = vector.broadcast %40 : vector<1x128xf32> to vector<16x128xf32>
      %42 = arith.mulf %39, %41 : vector<16x128xf32>
      %c0_25 = arith.constant 0 : index
      %c0_26 = arith.constant 0 : index
      %43 = vector.load %arg4[%c0_25, %c0_26] : memref<1x128xf32, #tpu.memory_space<vmem>>, vector<1x128xf32>
      %44 = vector.broadcast %43 : vector<1x128xf32> to vector<16x128xf32>
      %45 = arith.addf %42, %44 : vector<16x128xf32>
      %46 = arith.truncf %45 : vector<16x128xf32> to vector<16x128xbf16>
      %c0_27 = arith.constant 0 : index
      %c0_28 = arith.constant 0 : index
      %47 = vector.load %arg10[%c0_27, %c0_28] : memref<16x128xbf16, #tpu.memory_space<vmem>>, vector<16x128xbf16>
      tpu.vector_store %arg10[%c0_27, %c0_28], %46 {strides = array<i32>} : memref<16x128xbf16, #tpu.memory_space<vmem>>, vector<16x128xbf16>,
      %cst_29 = arith.constant 0.000000e+00 : f32
      %48 = vector.broadcast %cst_29 : f32 to vector<1x16xf32>
      %c0_30 = arith.constant 0 : index
      %c0_31 = arith.constant 0 : index
      %49 = vector.load %arg11[%c0_30, %c0_31] : memref<1x16xf32, #tpu.memory_space<vmem>>, vector<1x16xf32>
      tpu.vector_store %arg11[%c0_30, %c0_31], %48 {strides = array<i32>} : memref<1x16xf32, #tpu.memory_space<vmem>>, vector<1x16xf32>,
    } else {
    }
    %c0 = arith.constant 0 : index
    %c0_1 = arith.constant 0 : index
    %3 = vector.load %arg10[%c0, %c0_1] : memref<16x128xbf16, #tpu.memory_space<vmem>>, vector<16x128xbf16>
    %c0_2 = arith.constant 0 : index
    %c0_3 = arith.constant 0 : index
    %4 = vector.load %arg5[%c0_2, %c0_3] : memref<128x128xbf16, #tpu.memory_space<vmem>>, vector<128x128xbf16>
    %cst = arith.constant dense<0.000000e+00> : vector<16x128xf32>
    %5 = tpu.matmul %3, %4, %cst {dimension_numbers = #tpu.dot_dimension_numbers<[1], [0], [0], [1], [0, 0, 1, 1], [], []>} : vector<16x128xbf16>, vector<128x128xbf16>, vector<16x128xf32> -> vector<16x128xf32>
    %c0_4 = arith.constant 0 : index
    %c0_5 = arith.constant 0 : index
    %6 = vector.load %arg6[%c0_4, %c0_5] : memref<1x128xf32, #tpu.memory_space<vmem>>, vector<1x128xf32>
    %7 = vector.broadcast %6 : vector<1x128xf32> to vector<16x128xf32>
    %8 = arith.addf %5, %7 : vector<16x128xf32>
    %9 = math.tanh %8 : vector<16x128xf32>
    %c0_6 = arith.constant 0 : index
    %c0_7 = arith.constant 0 : index
    %10 = vector.load %arg11[%c0_6, %c0_7] : memref<1x16xf32, #tpu.memory_space<vmem>>, vector<1x16xf32>
    %c0_8 = arith.constant 0 : index
    %c0_9 = arith.constant 0 : index
    %11 = vector.load %arg7[%c0_8, %c0_9] : memref<1x128xbf16, #tpu.memory_space<vmem>>, vector<1x128xbf16>
    %12 = arith.truncf %9 : vector<16x128xf32> to vector<16x128xbf16>
    %cst_10 = arith.constant dense<0.000000e+00> : vector<1x16xf32>
    %13 = tpu.matmul %11, %12, %cst_10 {dimension_numbers = #tpu.dot_dimension_numbers<[1], [1], [0], [0], [0, 0, 1, 0], [], []>} : vector<1x128xbf16>, vector<16x128xbf16>, vector<1x16xf32> -> vector<1x16xf32>
    %14 = arith.addf %10, %13 : vector<1x16xf32>
    %c0_11 = arith.constant 0 : index
    %c0_12 = arith.constant 0 : index
    %15 = vector.load %arg11[%c0_11, %c0_12] : memref<1x16xf32, #tpu.memory_space<vmem>>, vector<1x16xf32>
    tpu.vector_store %arg11[%c0_11, %c0_12], %14 {strides = array<i32>} : memref<1x16xf32, #tpu.memory_space<vmem>>, vector<1x16xf32>,
    %c0_i32_13 = arith.constant 0 : i32
    %16 = arith.cmpi eq, %arg1, %c0_i32_13 : i32
    %17 = arith.extui %16 : i1 to i32
    %c0_i32_14 = arith.constant 0 : i32
    %18 = arith.cmpi ne, %17, %c0_i32_14 : i32
    scf.if %18 {
      %c0_15 = arith.constant 0 : index
      %c0_16 = arith.constant 0 : index
      %19 = vector.load %arg11[%c0_15, %c0_16] : memref<1x16xf32, #tpu.memory_space<vmem>>, vector<1x16xf32>
      %cst_17 = arith.constant dense<0xFF800000> : vector<1xf32>
      %20 = vector.multi_reduction <maximumf>, %19, %cst_17 [1] : vector<1x16xf32> to vector<1xf32>
      %21 = vector.shape_cast %20 : vector<1xf32> to vector<1x1xf32>
      %22 = vector.broadcast %21 : vector<1x1xf32> to vector<1x16xf32>
      %23 = arith.subf %19, %22 : vector<1x16xf32>
      %24 = math.exp %23 : vector<1x16xf32>
      %cst_18 = arith.constant dense<0.000000e+00> : vector<1xf32>
      %25 = vector.multi_reduction <add>, %24, %cst_18 [1] : vector<1x16xf32> to vector<1xf32>
      %26 = vector.shape_cast %25 : vector<1xf32> to vector<1x1xf32>
      %27 = tpu.reciprocal %26 {approx = true} : vector<1x1xf32> -> vector<1x1xf32>
      %28 = vector.broadcast %27 : vector<1x1xf32> to vector<1x16xf32>
      %29 = arith.mulf %24, %28 : vector<1x16xf32>
      %30 = arith.truncf %29 : vector<1x16xf32> to vector<1x16xbf16>
      %c0_19 = arith.constant 0 : index
      %c0_20 = arith.constant 0 : index
      %31 = vector.load %arg10[%c0_19, %c0_20] : memref<16x128xbf16, #tpu.memory_space<vmem>>, vector<16x128xbf16>
      %32 = arith.extf %31 : vector<16x128xbf16> to vector<16x128xf32>
      %33 = arith.mulf %32, %32 : vector<16x128xf32>
      %34 = arith.truncf %33 : vector<16x128xf32> to vector<16x128xbf16>
      %cst_21 = arith.constant dense<0.000000e+00> : vector<1x128xf32>
      %35 = tpu.matmul %30, %31, %cst_21 {dimension_numbers = #tpu.dot_dimension_numbers<[1], [0], [0], [1], [0, 0, 1, 1], [], []>} : vector<1x16xbf16>, vector<16x128xbf16>, vector<1x128xf32> -> vector<1x128xf32>
      %cst_22 = arith.constant dense<0.000000e+00> : vector<1x128xf32>
      %36 = tpu.matmul %30, %34, %cst_22 {dimension_numbers = #tpu.dot_dimension_numbers<[1], [0], [0], [1], [0, 0, 1, 1], [], []>} : vector<1x16xbf16>, vector<16x128xbf16>, vector<1x128xf32> -> vector<1x128xf32>
      %37 = arith.mulf %35, %35 : vector<1x128xf32>
      %38 = arith.subf %36, %37 : vector<1x128xf32>
      %cst_23 = arith.constant 9.99999974E-6 : f32
      %39 = vector.broadcast %cst_23 : f32 to vector<1x128xf32>
      %40 = arith.maximumf %38, %39 : vector<1x128xf32>
      %41 = math.sqrt %40 : vector<1x128xf32>
      %c0_24 = arith.constant 0 : index
      %c0_25 = arith.constant 0 : index
      %c0_26 = arith.constant 0 : index
      %42 = vector.load %arg8[%c0_24, %c0_25, %c0_26] : memref<1x1x128xf32, #tpu.memory_space<vmem>>, vector<1x1x128xf32>
      %43 = vector.shape_cast %42 : vector<1x1x128xf32> to vector<1x128xf32>
      %44 = vector.shape_cast %35 : vector<1x128xf32> to vector<1x1x128xf32>
      tpu.vector_store %arg8[%c0_24, %c0_25, %c0_26], %44 {strides = array<i32>} : memref<1x1x128xf32, #tpu.memory_space<vmem>>, vector<1x1x128xf32>,
      %c0_27 = arith.constant 0 : index
      %c0_28 = arith.constant 0 : index
      %c0_29 = arith.constant 0 : index
      %45 = vector.load %arg9[%c0_27, %c0_28, %c0_29] : memref<1x1x128xf32, #tpu.memory_space<vmem>>, vector<1x1x128xf32>
      %46 = vector.shape_cast %45 : vector<1x1x128xf32> to vector<1x128xf32>
      %47 = vector.shape_cast %41 : vector<1x128xf32> to vector<1x1x128xf32>
      tpu.vector_store %arg9[%c0_27, %c0_28, %c0_29], %47 {strides = array<i32>} : memref<1x1x128xf32, #tpu.memory_space<vmem>>, vector<1x1x128xf32>,
    } else {
    }
    return
  }
  func.func @transform_0(%arg0: i32, %arg1: i32) -> (i32, i32, i32) {
    %c0_i32 = arith.constant 0 : i32
    %c0_i32_0 = arith.constant 0 : i32
    %c0_i32_1 = arith.constant 0 : i32
    return %arg0, %c0_i32, %c0_i32_0 : i32, i32, i32
  }
  func.func @transform_1(%arg0: i32, %arg1: i32) -> (i32, i32) {
    %c0_i32 = arith.constant 0 : i32
    %c0_i32_0 = arith.constant 0 : i32
    %c0_i32_1 = arith.constant 0 : i32
    return %c0_i32, %c0_i32_0 : i32, i32
  }
  func.func @transform_2(%arg0: i32, %arg1: i32) -> (i32, i32) {
    %c0_i32 = arith.constant 0 : i32
    %c0_i32_0 = arith.constant 0 : i32
    %c0_i32_1 = arith.constant 0 : i32
    return %c0_i32, %c0_i32_0 : i32, i32
  }
  func.func @transform_3(%arg0: i32, %arg1: i32) -> (i32, i32) {
    %c0_i32 = arith.constant 0 : i32
    %c0_i32_0 = arith.constant 0 : i32
    return %c0_i32, %arg1 : i32, i32
  }
  func.func @transform_4(%arg0: i32, %arg1: i32) -> (i32, i32) {
    %c0_i32 = arith.constant 0 : i32
    %c0_i32_0 = arith.constant 0 : i32
    return %c0_i32, %arg1 : i32, i32
  }
  func.func @transform_5(%arg0: i32, %arg1: i32) -> (i32, i32) {
    %c0_i32 = arith.constant 0 : i32
    %c0_i32_0 = arith.constant 0 : i32
    return %c0_i32, %arg1 : i32, i32
  }
  func.func @transform_6(%arg0: i32, %arg1: i32) -> (i32, i32, i32) {
    %c0_i32 = arith.constant 0 : i32
    %c0_i32_0 = arith.constant 0 : i32
    %c0_i32_1 = arith.constant 0 : i32
    return %arg0, %c0_i32, %c0_i32_0 : i32, i32, i32
  }
  func.func @transform_7(%arg0: i32, %arg1: i32) -> (i32, i32, i32) {
    %c0_i32 = arith.constant 0 : i32
    %c0_i32_0 = arith.constant 0 : i32
    %c0_i32_1 = arith.constant 0 : i32
    return %arg0, %c0_i32, %c0_i32_0 : i32, i32, i32
  }
}

</mosaic_0001>

<bundles_post_ra>
// kernel: tpu_custom_call.1
= control target key start
LH: loop header
LB: loop body
LE: loop exit
PB: predicated region body
PF: predicated region fallthrough
CT: control target
= control target key end

     0   :  { %s1581_s0 = inlined_call_operand.hbm [shape: bf16[2,16,128], index: 0, kind: input, shape index: {}]   ;;  %s1582_s1 = inlined_call_operand.vmem [shape: f32[1,128], index: 1, kind: input, shape index: {}]   ;;  %s1583_s2 = inlined_call_operand.vmem [shape: f32[1,128], index: 2, kind: input, shape index: {}]   ;;  %s1584_s3 = inlined_call_operand.hbm [shape: bf16[128,128], index: 3, kind: input, shape index: {}]   ;;  %s1585_s4 = inlined_call_operand.vmem [shape: f32[1,128], index: 4, kind: input, shape index: {}]   ;;  %s1586_s5 = inlined_call_operand.vmem [shape: bf16[1,128], index: 5, kind: input, shape index: {}]   ;;  %s1587_s6 = inlined_call_operand.hbm [shape: f32[2,1,128], index: 6, kind: output, shape index: {0}]   ;;  %s1588_s7 = inlined_call_operand.hbm [shape: f32[2,1,128], index: 7, kind: output, shape index: {1}]  }
   0x1   :  { %1595 = sst [smem:[#allocation16_spill]] %s1584_s3 }
   0x2   :  { %13 = vsyncpa [#allocation5], 0 }
   0x3   :  { %15 = vsyncpa [#allocation5 + $0x1], 0 }
   0x4   :  { %16 = vsyncpa [#allocation8], 0 }
   0x5   :  { %17 = vsyncpa [#allocation6], 0 }
   0x6   :  { %19 = vsyncpa [#allocation6 + $0x1], 0 }
   0x7   :  { %20 = vsyncpa [#allocation11], 0 }
   0x8   :  { %22 = vsyncpa [#allocation11 + $0x1], 0  ;;  %s1287_s24 = smov 0   ;;  %s1289_s25 = smov 0  }
   0x9   :  { %s1291_s26 = smov 0   ;;  %s1293_s27 = smov 0  }
   0xa   :  { %s1295_s28 = smov 0   ;;  %s1297_s29 = smov 0  }
   0xb LB: > { %s869_s30 = sadd.s32 4294967295, %s1237_s29   ;;  %s870_s8 = sadd.s32 4294967294, %s1237_s29   ;;  %s1237_s29 = sphi %s1297_s29, %s28_s29   ;;  %s1233_s28 = sphi %s1295_s28, %s1618_s28   ;;  %s1229_s27 = sphi %s1293_s27, %s1617_s27   ;;  %s1225_s26 = sphi %s1291_s26, %s1616_s26   ;;  %s1221_s25 = sphi %s1289_s25, %s1615_s25   ;;  %s1217_s24 = sphi %s1287_s24, %s1614_s24  }
   0xc   : > { %p60_p0 = scmp.ne.s32.totalorder %s1221_s25, %s1217_s24  ;;  %p1321_p1 = scmp.eq.s32.totalorder %s869_s30, 0 }
   0xd   : > { %p1325_p2 = scmp.eq.s32.totalorder %s869_s30, 1  ;;  %p210_p3 = scmp.eq.s32.totalorder %s870_s8, 1 }
   0xe   : > { %s1596_s9 = scalar_select %p1321_p1, 1, 0 }
   0xf   : > { %s1597_s10 = scalar_select %p1325_p2, 1, 0 }
  0x10   : > { %p1331_p4 = por %p1321_p1, %p60_p0  ;;  %p871_p5 = scmp.ge.s32.totalorder %s1237_s29, 1 }
  0x11   : > { %p1336_p6 = por %p210_p3, %p60_p0  ;;  %p243_p7 = scmp.lt.s32.totalorder %s1237_s29, 3 }
  0x12   : > { %s1598_s11 = scalar_select %p1331_p4, 1, 0 }
  0x13   : > { %s1599_s12 = scalar_select %p1336_p6, 1, 0 }
  0x14   : > { %p1341_p8 = pnand %p871_p5, %p243_p7  ;;  %s1239_s14 = smov [#allocation7]  }
  0x15   : > { %s263_s15 = sshll.u32 %s1239_s14, 4  ;;  %s40_s17 = sadd.s32 1, %s1233_s28  ;;  %s264_s15 = int_to_ptr.vmem [resolvable:$true] %s263_s15 }
  0x16   : > { %s1600_s13 = scalar_select %p1341_p8, 1, 0 }
  0x17   : > { %p967_p9 = pneg %p1341_p8  ;;  %s1602_s3 = sld [smem:[#allocation16_spill]] }
  0x19   : > { %p1350_p11 = pnand %p967_p9, %p1321_p1 }
  0x1b   : > { %p1063_p13 = pneg %p1350_p11 }
  0x1d   : > { %s1061_s20 = scalar_lea.hbm %s1602_s3, 1024 }
  0x1e   : > { %p1062_p12 = scmp.ne.s32.totalorder %s1602_s3, %s1061_s20  ;;  %p1068_p5 = scmp.lt.u32.totalorder %s1061_s20, %s1602_s3 }
  0x20   : > { %p1064_p0 = pnand %p1063_p13, %p1062_p12 }
  0x22   : > { %p1065_p3 = pneg %p1064_p0 }
  0x24   : > { %p1070_p7 = pnand %p1068_p5, %p1065_p3 }
  0x26   : > { %1073 = shalt.err (!%p1070_p7)
}
  0x27   : > { %s1074_s8 = scalar_lea.vmem %s264_s15, 1024  ;;  %p1082_p1 = scmp.lt.s32.totalorder %s264_s15, %s264_s15 }
  0x28   : > { %p1075_p9 = scmp.ne.s32.totalorder %s264_s15, %s1074_s8  ;;  %p1083_p4 = scmp.lt.s32.totalorder %s1074_s8, %s1074_s8 }
  0x2a   : > { %p1077_p10 = pnand %p1075_p9, %p1063_p13  ;;  %p1084_p8 = por %p1083_p4, %p1082_p1 }
  0x2c   : > { %p1078_p6 = pneg %p1077_p10 }
  0x2e   : > { %p1085_p2 = pnand %p1084_p8, %p1078_p6 }
  0x30   : > { %1088 = shalt.err (!%p1085_p2)
}
  0x31   : > { %s1593_s14 = smov 64   ;;  %s1594_s18 = smov 4  }
  0x32   : > { %970 = dma.hbm_to_vmem [thread:$0]  (!%p1350_p11), %s1602_s3, 1024, %s264_s15, [#allocation8], %s1593_s14, %s1593_s14, %s1594_s18  }
  0x33   : > { %p42_p1 = scmp.ge.s32.totalorder %s40_s17, 2  ;;  %s47_s21 = sadd.s32 1, %s1225_s26 }
  0x34   : > { %p54_p2 = scmp.ne.s32.totalorder %s1225_s26, %s1221_s25  ;;  %p55_p4 = scmp.eq.s32.totalorder %s1237_s29, 0 }
  0x35   : > { %s1620_s17 = smov (%p42_p1, %s40_s17), 0  ;;  %p1604_p8 = scmp.ne.s32.totalorder %s1597_s10, 0 }
  0x36   : > { %p1380_p6 = por %p55_p4, %p54_p2  ;;  %s44_s23 = ssub.s32 %s1233_s28, %s1620_s17 }
  0x37   : > { %p1386_p10 = por %p1604_p8, %p54_p2  ;;  %p983_p12 = scmp.lt.s32.totalorder %s1237_s29, 2 }
  0x38   : > { %p45_p11 = scmp.eq.s32.totalorder %s44_s23, 0  ;;  %s289_s15 = sand.u32 1, %s1225_s26  }
  0x39   : > { %s876_s30 = sshll.u32 %s289_s15, 3  ;;  %s899_s19 = sshll.u32 %s1233_s28, 7 }
  0x3a   : > { %s1395_s8 = scalar_select %p45_p11, %s1225_s26, %s47_s21  }
  0x3b   : > { %s1401_s18 = scalar_lea.hbm %s1581_s0, %s899_s19  ;;  %s293_s10 = scalar_lea.vmem [#allocation4], %s876_s30 }
  0x3c   : > { %s300_s3 = sshll.u32 %s293_s10, 4  ;;  %p1407_p13 = pnand %p983_p12, %p1380_p6  ;;  %s1403_s3 = int_to_ptr.vmem [resolvable:$true] %s300_s3 }
  0x3d   : > { %s1411_s21 = scalar_lea.sflag [#allocation5], %s289_s15  ;;  %s1089_s14 = scalar_lea.hbm %s1401_s18, 128 }
  0x3e   : > { %p1090_p0 = scmp.ne.s32.totalorder %s1401_s18, %s1089_s14  ;;  %p1091_p3 = pneg %p1407_p13 }
  0x3f   : > { %s1094_s22 = scalar_lea.hbm %s1581_s0, 256  ;;  %p1095_p9 = scmp.lt.u32.totalorder %s1401_s18, %s1581_s0 }
  0x40   : > { %p1092_p5 = pnand %p1091_p3, %p1090_p0  ;;  %p1096_p1 = scmp.lt.u32.totalorder %s1094_s22, %s1089_s14 }
  0x41   : > { %p1098_p4 = scmp.lt.u32.totalorder %s1089_s14, %s1401_s18 }
  0x42   : > { %p1093_p7 = pneg %p1092_p5  ;;  %p1097_p2 = por %p1096_p1, %p1095_p9 }
  0x44   : > { %p1099_p6 = por %p1098_p4, %p1097_p2 }
  0x46   : > { %p1100_p8 = pnand %p1099_p6, %p1093_p7 }
  0x48   : > { %1103 = shalt.err (!%p1100_p8)
}
  0x49   : > { %s1104_s15 = scalar_lea.vmem %s1403_s3, 128  ;;  %s1242_s30 = smov [#allocation4]  }
  0x4a   : > { %p1105_p12 = scmp.ne.s32.totalorder %s1403_s3, %s1104_s15  ;;  %s1109_s19 = sshll.u32 %s1242_s30, 4  ;;  %s1110_s19 = int_to_ptr.vmem [resolvable:$false] %s1109_s19 }
  0x4b   : > { %s1111_s20 = scalar_lea.vmem %s1110_s19, 256  ;;  %p1112_p5 = scmp.lt.s32.totalorder %s1403_s3, %s1110_s19 }
  0x4c   : > { %p1107_p11 = pnand %p1105_p12, %p1091_p3  ;;  %p1113_p9 = scmp.lt.s32.totalorder %s1111_s20, %s1104_s15 }
  0x4e   : > { %p1108_p0 = pneg %p1107_p11  ;;  %p1114_p1 = por %p1113_p9, %p1112_p5 }
  0x50   : > { %p1115_p2 = pnand %p1114_p1, %p1108_p0 }
  0x52   : > { %1118 = shalt.err (!%p1115_p2)
}
  0x53   : > { %s1607_s14 = smov 4   ;;  %s1608_s22 = smov 64  }
  0x54   : > { %974 = dma.hbm_to_vmem [thread:$0]  (!%p1407_p13), %s1401_s18, 128, %s1403_s3, %s1411_s21, %s1608_s22, %s1608_s22, %s1607_s14  }
  0x55   : > { %p1609_p3 = scmp.ne.s32.totalorder %s1600_s13, 0 }
  0x56   : > { %s1445_s10 = sand.u32 (!%p1609_p3), 1, %s1221_s25   ;;  %p1610_p7 = scmp.ne.s32.totalorder (!%p1609_p3), %s1598_s11, 0 }
  0x57   : > { %312 = sbr.rel (%p1609_p3) target bundleno = 1453 (0x5ad), region = 44  ;;  %s880_s15 = sshll.u32 (!%p1609_p3), %s1445_s10, 3 }
  0x58   : > { %s315_s30 = scalar_lea.sflag (!%p1609_p3), [#allocation5], %s1445_s10  ;;  %s318_s19 = scalar_lea.vmem (!%p1609_p3), [#allocation4], %s880_s15 }
  0x5e   : > { %1200 = dma.done.wait (%p1610_p7), %s315_s30, 128  }
  0x5f   : > { %1202 = vsyncadd (%p1610_p7), %s315_s30, 4294967168  ;;  %p1611_p4 = scmp.ne.s32.totalorder %s1596_s9, 0 }
  0x61   : > { %1204 = dma.done.wait (%p1611_p4), [#allocation8], 1024  }
  0x62   : > { %1206 = vsyncadd (%p1611_p4), [#allocation8], 4294966272  ;;  %v901_v0 = vld [vmem:[%s318_s19] sm:$0xff]   ;;  %v1039_v3 = vld [vmem:[#allocation7] sm:$0xff]   ;;  %v1243_v4 = vmov 0.0   ;;  %vm1244_vm0 = vmmov 0  }
  0x63   : > { %v902_v1 = vunpack.c.l.bf16 %v901_v0  ;;  %v903_v2 = vunpack.c.h.bf16 %v901_v0  ;;  %919 = vmatprep.subr.bf16.mxu0 %v1243_v4  ;;  %939 = vmatprep.subr.bf16.mxu1 %v1243_v4  ;;  %v1040_v13 = vld [vmem:[#allocation7 + $0x8] sm:$0xff]   ;;  %v1041_v14 = vld [vmem:[#allocation7 + $0x10] sm:$0xff]   ;;  %v1042_v15 = vld [vmem:[#allocation7 + $0x18] sm:$0xff]   ;;  %vm420_vm1 = vcmask 122880   ;;  %vm605_vm2 = vcmask 130048   ;;  %s355_s14 = scalar_lea.vmem [#allocation9], %s1445_s10 }
  0x64   : > { %920 = vmatpush3.bf16.msra.mxu0 %v1039_v3  ;;  %v1043_v16 = vld [vmem:[#allocation7 + $0x20] sm:$0xff]   ;;  %v1044_v17 = vld [vmem:[#allocation7 + $0x28] sm:$0xff]   ;;  %v1045_v18 = vld [vmem:[#allocation7 + $0x30] sm:$0xff]   ;;  %935 = vmatprep.mubr.msk.bf16.mxu0 %vm1244_vm0, %v1243_v4  ;;  %421 = vst.msk [vmem:[#allocation3] sm:$0x1] %vm420_vm1, %v1243_v4  ;;  %s718_s22 = sshll.u32 %s355_s14, 4  ;;  %s1495_s22 = int_to_ptr.vmem [resolvable:$true] %s718_s22 }
  0x65   : > { %377 = vadd.xlane.f32.xlu0 %v902_v1  ;;  %921 = vmatprep.subr.bf16.mxu0 %v1243_v4  ;;  %v1046_v19 = vld [vmem:[#allocation7 + $0x38] sm:$0xff]   ;;  %v882_v28 = vld [vmem:[%s1582_s1] ss:$0 sm:$0xff]  ;;  %s895_s15 = sshll.u32 %s1229_s27, 4  ;;  %s702_s9 = scalar_lea.sflag [#allocation6], %s1445_s10 }
  0x66   : > { %941 = vmatprep.mubr.msk.bf16.mxu1 %vm1244_vm0, %v1243_v4  ;;  %v883_v32 = vld [vmem:[%s1583_s2] ss:$0 sm:$0xff]  ;;  %s1502_s3 = scalar_lea.hbm %s1587_s6, %s895_s15  ;;  %s1119_s11 = scalar_lea.vmem %s1495_s22, 16 }
  0x67   : > { %v884_v37 = vld [vmem:[%s1585_s4] ss:$0 sm:$0xff]  ;;  %p1120_p13 = scmp.ne.s32.totalorder %s1495_s22, %s1119_s11  ;;  %s1245_s13 = smov [#allocation9]  }
  0x68   : > { %922 = vmatpush3.bf16.msra.mxu0 %v1040_v13  ;;  %v538_v47 = vld [vmem:[%s1586_s5] sm:$0x1]  ;;  %s1123_s18 = sshll.u32 %s1245_s13, 4  ;;  %s1124_s18 = int_to_ptr.vmem [resolvable:$false] %s1123_s18 }
  0x69   : > { %379 = vadd.xlane.f32.xlu0 %v903_v2  ;;  %923 = vmatprep.subr.bf16.mxu0 %v1243_v4  ;;  %p1121_p6 = pnand %p1120_p13, %p1386_p10  ;;  %s1125_s23 = scalar_lea.vmem %s1124_s18, 32 }
  0x6a   : > { %p1126_p12 = scmp.lt.s32.totalorder %s1495_s22, %s1124_s18  ;;  %p1127_p11 = scmp.lt.s32.totalorder %s1125_s23, %s1119_s11 }
  0x6b   : > { %v537_v48 = vld [vmem:[#allocation3] sm:$0x1]  ;;  %p1122_p8 = pneg %p1121_p6 }
  0x6c   : > { %924 = vmatpush3.bf16.msra.mxu0 %v1041_v14  ;;  %p1128_p0 = por %p1127_p11, %p1126_p12 }
  0x6d   : > { %925 = vmatprep.subr.bf16.mxu0 %v1243_v4 }
  0x6e   : > { %p1129_p5 = pnand %p1128_p0, %p1122_p8 }
  0x70   : > { %926 = vmatpush3.bf16.msra.mxu0 %v1042_v15 }
  0x71   : > { %927 = vmatprep.subr.bf16.mxu0 %v1243_v4 }
  0x74   : > { %928 = vmatpush3.bf16.msra.mxu0 %v1043_v16 }
  0x75   : > { %929 = vmatprep.subr.bf16.mxu0 %v1243_v4 }
  0x78   : > { %930 = vmatpush3.bf16.msra.mxu0 %v1044_v17 }
  0x79   : > { %931 = vmatprep.subr.bf16.mxu0 %v1243_v4 }
  0x7c   : > { %932 = vmatpush3.bf16.msra.mxu0 %v1045_v18 }
  0x7d   : > { %933 = vmatprep.subr.bf16.mxu0 %v1243_v4 }
  0x80   : > { %934 = vmatpush3.bf16.msra.mxu0 %v1046_v19 }
  0xf2   : > { %v378_v5 = vpop.xlane.xlu0 %377 }
  0xf3   : > { %v382_v6 = vmul.f32 0.0078125, %v378_v5 }
  0xf5   : > { %v384_v7 = vsub.f32 %v902_v1, %v382_v6 }
  0xf6   : > { %v380_v8 = vpop.xlane.xlu0 %379 }
  0xf7   : > { %v383_v9 = vmul.f32 0.0078125, %v380_v8  ;;  %v386_v10 = vmul.f32 %v384_v7, %v384_v7 }
  0xf9   : > { %v385_v11 = vsub.f32 %v903_v2, %v383_v9  ;;  %388 = vadd.xlane.f32.xlu1 %v386_v10 }
  0xfb   : > { %v387_v12 = vmul.f32 %v385_v11, %v385_v11 }
  0xfd   : > { %390 = vadd.xlane.f32.xlu1 %v387_v12 }
 0x186   : > { %v389_v20 = vpop.xlane.xlu1 %388 }
 0x187   : > { %v392_v21 = vmul.f32 0.0078125, %v389_v20 }
 0x189   : > { %v394_v22 = vadd.f32 1e-05, %v392_v21 }
 0x18a   : > { %v391_v23 = vpop.xlane.xlu1 %390 }
 0x18b   : > { %1047 = vrsqrt.f32 %v394_v22  ;;  %v393_v24 = vmul.f32 0.0078125, %v391_v23 }
 0x18d   : > { %v395_v25 = vadd.f32 1e-05, %v393_v24 }
 0x18f   : > { %1049 = vrsqrt.f32 %v395_v25 }
 0x195   : > { %v1048_v26 = vpop.eup %1047 }
 0x196   : > { %v398_v27 = vmul.f32 %v1048_v26, %v384_v7 }
 0x198   : > { %v407_v31 = vmul.f32 %v882_v28, %v398_v27 }
 0x199   : > { %v1050_v29 = vpop.eup %1049 }
 0x19a   : > { %v399_v30 = vmul.f32 %v1050_v29, %v385_v11  ;;  %v416_v34 = vadd.f32 %v883_v32, %v407_v31 }
 0x19c   : > { %v408_v33 = vmul.f32 %v882_v28, %v399_v30 }
 0x19e   : > { %v417_v35 = vadd.f32 %v883_v32, %v408_v33 }
 0x1a0   : > { %v418_v36 = vpack.c.bf16 %v417_v35, %v416_v34 }
 0x1a2   : > { %936 = vmatmul.mubr.bf16.vlgmr.msra.gmra.mrb[0].mxu0 %v418_v36  ;;  %v600_v62 = vunpack.c.l.bf16 %v418_v36  ;;  %v601_v63 = vunpack.c.h.bf16 %v418_v36 }
 0x1a4   : > { %v602_v1 = vmul.f32 %v600_v62, %v600_v62  ;;  %v603_v2 = vmul.f32 %v601_v63, %v601_v63 }
 0x1a6   : > { %v604_v6 = vpack.c.bf16 %v603_v2, %v602_v1 }
 0x275   : > { %v528_v38 = vpop.f32.mrb[0].mxu0 }
 0x276   : > { %v529_v39 = vadd.f32 %v884_v37, %v528_v38  ;;  %v937_v40 = vpop.f32.mrb[1].mxu0 }
 0x277   : > { %v531_v41 = vpop.f32.mrb[2].mxu0 }
 0x278   : > { %v532_v42 = vadd.f32 %v884_v37, %v531_v41  ;;  %v938_v43 = vpop.f32.mrb[3].mxu0  ;;  %1051 = vtanh.f32 %v529_v39 }
 0x27a   : > { %1053 = vtanh.f32 %v532_v42 }
 0x282   : > { %v1052_v44 = vpop.eup %1051 }
 0x284   : > { %v1054_v45 = vpop.eup %1053 }
 0x285   : > { %v539_v46 = vpack.c.bf16 %v1054_v45, %v1052_v44 }
 0x287   : > { %940 = vmatpush3.bf16.xpose.msra.mxu1 %v539_v46 }
 0x288   : > { %945 = vmatprep.subr.bf16.mxu1 %v1243_v4 }
 0x28e   : > { %942 = vmatmul.mubr.bf16.vlgmr.msra.gmra.mrb[0].mxu1 %v538_v47 }
 0x28f   : > { %946 = vmatpush3.bf16.msra.mxu1 %v418_v36  ;;  %947 = vmatprep.mubr.msk.bf16.mxu1 %vm1244_vm0, %v1243_v4 }
 0x290   : > { %951 = vmatprep.subr.bf16.mxu1 %v1243_v4 }
 0x361   : > { %v574_v49 = vpop.f32.mrb[0].mxu1 }
 0x362   : > { %v580_v50 = vadd.f32 %v574_v49, %v537_v48  ;;  %v943_v51 = vpop.f32.mrb[1].mxu1 }
 0x363   : > { %v577_v52 = vpop.f32.mrb[2].mxu1 }
 0x364   : > { %582 = vst.msk [vmem:[#allocation3] sm:$0x1] %vm420_vm1, %v580_v50  ;;  %v944_v53 = vpop.f32.mrb[3].mxu1 }
 0x36b   : > { %v586_v54 = vld [vmem:[#allocation3] sm:$0x1] }
 0x36c   : > { %v587_v55 = vsel %vm420_vm1, %v586_v54, -inf }
 0x36d   : > { %588 = vmax.xlane.f32.xlu0 %v587_v55 }
 0x3fa   : > { %v589_v56 = vpop.xlane.xlu0 %588 }
 0x3fb   : > { %v590_v57 = vsub.f32 %v586_v54, %v589_v56 }
 0x3fd   : > { %v591_v58 = vmul.f32 1.442695, %v590_v57 }
 0x3ff   : > { %1055 = vpow2.f32 %v591_v58 }
 0x409   : > { %v1056_v59 = vpop.eup %1055 }
 0x40a   : > { %v593_v60 = vsel %vm420_vm1, %v1056_v59, 0.0 }
 0x40b   : > { %594 = vadd.xlane.f32.xlu1 %v593_v60 }
 0x498   : > { %v595_v61 = vpop.xlane.xlu1 %594 }
 0x499   : > { %1057 = vrcp.f32 %v595_v61 }
 0x4a3   : > { %v1058_v0 = vpop.eup %1057 }
 0x4a4   : > { %v597_v3 = vmul.f32 %v1058_v0, %v1056_v59 }
 0x4a6   : > { %v598_v5 = vpack.c.bf16 %v597_v3, %v597_v3 }
 0x4a8   : > { %948 = vmatmul.mubr.msk.bf16.vlgmr.msra.gmra.mrb[4].mxu1 %vm605_vm2, %v598_v5 }
 0x4a9   : > { %952 = vmatpush3.bf16.msra.mxu1 %v604_v6  ;;  %953 = vmatprep.mubr.msk.bf16.mxu1 %vm1244_vm0, %v1243_v4 }
 0x4b0   : > { %954 = vmatmul.mubr.msk.bf16.vlgmr.msra.gmra.mrb[8].mxu1 %vm605_vm2, %v598_v5 }
 0x57b   : > { %v643_v7 = vpop.f32.mrb[4].mxu1 }
 0x57c   : > { %699 = vst [vmem:[%s355_s14] sm:$0x1] %v643_v7  ;;  %v949_v8 = vpop.f32.mrb[5].mxu1 }
 0x57d   : > { %v646_v9 = vpop.f32.mrb[6].mxu1 }
 0x57e   : > { %1132 = shalt.err (!%p1129_p5)
}
 0x57f   : > { %s1133_s21 = scalar_lea.hbm %s1502_s3, 16  ;;  %s1137_s30 = scalar_lea.hbm %s1587_s6, 32 }
 0x580   : > { %p1134_p9 = scmp.ne.s32.totalorder %s1502_s3, %s1133_s21  ;;  %p1138_p3 = scmp.lt.u32.totalorder %s1502_s3, %s1587_s6 }
 0x581   : > { %p1139_p7 = scmp.lt.u32.totalorder %s1137_s30, %s1133_s21  ;;  %p1141_p13 = scmp.lt.u32.totalorder %s1133_s21, %s1502_s3 }
 0x582   : > { %p1135_p1 = pnand %p1134_p9, %p1386_p10 }
 0x583   : > { %p1140_p4 = por %p1139_p7, %p1138_p3 }
 0x584   : > { %p1136_p2 = pneg %p1135_p1 }
 0x585   : > { %p1142_p6 = por %p1141_p13, %p1140_p4 }
 0x587   : > { %p1143_p8 = pnand %p1142_p6, %p1136_p2 }
 0x589   : > { %1146 = shalt.err (!%p1143_p8)
}
 0x58a   : > { %963 = dma.vmem_to_hbm [thread:$0]  (%p1386_p10), %s1495_s22, 16, %s1502_s3, %s702_s9   ;;  %v950_v4 = vpop.f32.mrb[7].mxu1  ;;  %v689_v10 = vmul.f32 %v643_v7, %v643_v7 }
 0x58b   : > { %v683_v11 = vpop.f32.mrb[8].mxu1  ;;  %s361_s11 = scalar_lea.vmem [#allocation10], %s1445_s10  ;;  %s1532_s9 = scalar_lea.hbm %s1588_s7, %s895_s15 }
 0x58c   : > { %v690_v12 = vsub.f32 %v683_v11, %v689_v10  ;;  %v955_v13 = vpop.f32.mrb[9].mxu1  ;;  %s731_s18 = sshll.u32 %s361_s11, 4  ;;  %s706_s23 = scalar_lea.sflag [#allocation11], %s1445_s10  ;;  %s1534_s18 = int_to_ptr.vmem [resolvable:$true] %s731_s18 }
 0x58d   : > { %v686_v14 = vpop.f32.mrb[10].mxu1  ;;  %s1147_s21 = scalar_lea.vmem %s1534_s18, 16  ;;  %s1246_s20 = smov [#allocation10]  }
 0x58e   : > { %v691_v15 = vmax.f32 %v690_v12, 1e-05  ;;  %v956_v16 = vpop.f32.mrb[11].mxu1  ;;  %p1148_p12 = scmp.ne.s32.totalorder %s1534_s18, %s1147_s21  ;;  %s1151_s27 = sshll.u32 %s1246_s20, 4  ;;  %s1152_s27 = int_to_ptr.vmem [resolvable:$false] %s1151_s27 }
 0x58f   : > { %s1153_s14 = scalar_lea.vmem %s1152_s27, 32  ;;  %p1154_p5 = scmp.lt.s32.totalorder %s1534_s18, %s1152_s27 }
 0x590   : > { %1059 = vrsqrt.f32 %v691_v15  ;;  %vm694_vm3 = vcmp.eq.f32.partialorder %v691_v15, inf  ;;  %v697_v19 = vand.u32 2147483648, %v691_v15  ;;  %vm696_vm4 = vcmp.eq.f32.partialorder %v691_v15, 0.0  ;;  %p1149_p11 = pnand %p1148_p12, %p1386_p10  ;;  %p1155_p9 = scmp.lt.s32.totalorder %s1153_s14, %s1147_s21 }
 0x592   : > { %p1150_p0 = pneg %p1149_p11  ;;  %p1156_p1 = por %p1155_p9, %p1154_p5 }
 0x594   : > { %p1157_p2 = pnand %p1156_p1, %p1150_p0 }
 0x59a   : > { %v1060_v17 = vpop.eup %1059 }
 0x59b   : > { %v693_v18 = vmul.f32 %v1060_v17, %v691_v15 }
 0x59d   : > { %v695_v20 = vsel %vm694_vm3, %v691_v15, %v693_v18 }
 0x59e   : > { %v698_v21 = vsel %vm696_vm4, %v697_v19, %v695_v20 }
 0x59f   : > { %700 = vst [vmem:[%s361_s11] sm:$0x1] %v698_v21 }
 0x5a0   : > { %1160 = shalt.err (!%p1157_p2)
}
 0x5a1   : > { %s1161_s10 = scalar_lea.hbm %s1532_s9, 16  ;;  %s1165_s19 = scalar_lea.hbm %s1588_s7, 32 }
 0x5a2   : > { %p1162_p3 = scmp.ne.s32.totalorder %s1532_s9, %s1161_s10  ;;  %p1166_p13 = scmp.lt.u32.totalorder %s1532_s9, %s1588_s7 }
 0x5a3   : > { %p1167_p6 = scmp.lt.u32.totalorder %s1165_s19, %s1161_s10  ;;  %p1169_p12 = scmp.lt.u32.totalorder %s1161_s10, %s1532_s9 }
 0x5a4   : > { %p1163_p7 = pnand %p1162_p3, %p1386_p10 }
 0x5a5   : > { %p1168_p8 = por %p1167_p6, %p1166_p13 }
 0x5a6   : > { %p1164_p4 = pneg %p1163_p7 }
 0x5a7   : > { %p1170_p11 = por %p1169_p12, %p1168_p8 }
 0x5a9   : > { %p1171_p0 = pnand %p1170_p11, %p1164_p4 }
 0x5ab   : > { %1174 = shalt.err (!%p1171_p0)
}
 0x5ac   : > { %964 = dma.vmem_to_hbm [thread:$0]  (%p1386_p10), %s1534_s18, 16, %s1532_s9, %s706_s23  }
 0x5ad PF: > { %s743_s22 = sand.u32 1, %s1217_s24   ;;  %p1612_p5 = scmp.ne.s32.totalorder %s1599_s12, 0 }
 0x5ae   : > { %p1613_p9 = scmp.ge.s32.totalorder %s1237_s29, 2  ;;  %s744_s3 = scalar_lea.sflag [#allocation6], %s743_s22 }
 0x5b0   : > { %p976_p1 = pnand %p1613_p9, %p1612_p5 }
 0x5b2   : > { %1208 = dma.done.wait (!%p976_p1), %s744_s3, 16  }
 0x5b3   : > { %1210 = vsyncadd (!%p976_p1), %s744_s3, 4294967280  ;;  %s752_s21 = scalar_lea.sflag [#allocation11], %s743_s22 }
 0x5b4   : > { %1212 = dma.done.wait (!%p976_p1), %s752_s21, 16  }
 0x5b5   : > { %1214 = vsyncadd (!%p976_p1), %s752_s21, 4294967280  ;;  %s28_s29 = sadd.s32 1, %s1237_s29   ;;  %s1614_s24 = smov %s1221_s25 }
 0x5b6   : > { %p25_p2 = scmp.ge.s32.totalorder %s28_s29, 4   ;;  %s1615_s25 = smov %s1225_s26 }
 0x5b7   : > { %s1616_s26 = smov %s1395_s8  ;;  %s1617_s27 = smov %s1233_s28 }
 0x5b8   : > { %s1618_s28 = smov %s1620_s17  ;;  %27 = sbr.rel (!%p25_p2) target bundleno = 11 (0xb), region = 125 }
 0x5bf   :  { %756 = vsyncpa [#allocation5], 1 }
 0x5c0   :  { %758 = vsyncpa [#allocation5 + $0x1], 1 }
 0x5c1   :  { %759 = vsyncpa [#allocation8], 1 }
 0x5c2   :  { %760 = vsyncpa [#allocation6], 1 }
 0x5c3   :  { %762 = vsyncpa [#allocation6 + $0x1], 1 }
 0x5c4   :  { %763 = vsyncpa [#allocation11], 1 }
 0x5c5   :  { %765 = vsyncpa [#allocation11 + $0x1], 1 }

</bundles_post_ra>
